<compile_context>
chip_gen: v5e
topology: v5e:2x2
jax: 0.10.0
libtpu: 0.0.40
codegen_flags: <defaults>
</compile_context>

<pallas_src>
import functools

import numpy as np
import jax
import jax.numpy as jnp
from jax.experimental import pallas as pl
from jax.experimental.pallas import tpu as pltpu

LN_EPS = 1e-5  # torch.nn.LayerNorm default


def _round_up(a, b):
    return -(-a // b) * b


def _vmem_limits():
    """(vmem_limit_bytes, tile_budget_bytes), generation-aware."""
    default_cap = 128 * 1024 * 1024
    try:
        cap = getattr(pltpu.get_tpu_info(), "vmem_capacity_bytes", default_cap)
    except Exception:  # e.g. interpret mode / no TPU info available
        cap = default_cap
    # 48 MiB on v5e/v6e (128 MiB VMEM), ~38 MiB on v7x (64 MiB per TC).
    limit = min(48 * 1024 * 1024, int(cap * 0.6))
    budget = max(limit - 8 * 1024 * 1024, limit // 2)
    return limit, budget


def _choose_tile_m(n_tokens, d_pad, bn_pad, w_itemsize, budget_bytes):
    """Largest token tile (rows) that keeps the pipeline inside the VMEM budget."""
    n_rows = _round_up(n_tokens, 8)
    # Single-buffered per-language params (W1/W2 in the matmul dtype, rest f32).
    fixed = w_itemsize * 2 * d_pad * bn_pad + 4 * (3 * d_pad + bn_pad)
    # Per token row: double-buffered f32 x/out tiles + live f32/cast temporaries.
    per_row = 4 * (7 * d_pad + 3 * bn_pad)
    for cand in (1024, 512, 256, 128, 64, 32, 16, 8):
        if fixed + cand * per_row <= budget_bytes:
            return min(cand, n_rows)
    return min(8, n_rows)


def adapter_kernel(lang_ref, x_ref, g_ref, beta_ref,
                   w1_ref, b1_ref, w2_ref, b2_ref, o_ref,
                   *, inv_d, matmul_dtype):
    # x_ref: (TM, Dp) tile of tokens; parameter refs already point at the
    # lang_idx-selected slice thanks to the scalar-prefetch index_maps.
    del lang_ref
    x = x_ref[...]                                   # (TM, Dp) f32

    # --- LayerNorm over the true feature dim D (one-pass, biased variance) ---
    # Zero-padded feature columns contribute 0 to both sums, so dividing by
    # the true D (inv_d) keeps the statistics exact.
    s1 = jnp.sum(x, axis=-1, keepdims=True)
    s2 = jnp.sum(x * x, axis=-1, keepdims=True)
    mu = s1 * inv_d
    var = jnp.maximum(s2 * inv_d - mu * mu, 0.0)
    xn = (x - mu) * jax.lax.rsqrt(var + LN_EPS)
    xn = xn * g_ref[0] + beta_ref[0]                 # padded cols -> 0 (gamma/beta zero-padded)

    # --- FeedForward: Linear -> ReLU -> (Dropout no-op @ eval) -> Linear ---
    # Weights arrive pre-cast to matmul_dtype from the wrapper; only the
    # activations are cast here (no per-step weight cast on the VPU).
    h = jnp.dot(xn.astype(matmul_dtype), w1_ref[0],
                preferred_element_type=jnp.float32) + b1_ref[0]
    h = jnp.maximum(h, 0.0)
    # TODO(synk): FairseqDropout is identity in eval mode; training-mode dropout omitted.
    y = jnp.dot(h.astype(matmul_dtype), w2_ref[0],
                preferred_element_type=jnp.float32) + b2_ref[0]

    # --- residual ---
    o_ref[...] = x + y


@functools.partial(jax.jit, static_argnames=("tile_m", "matmul_dtype", "alias_input"))
def multilingual_adapter(x, lang_idx, params, *, tile_m=None,
                         matmul_dtype=jnp.float32, alias_input=False):
    """x: (T, B, D) f32. lang_idx: scalar int32. params: dict of L-stacked weights."""
    T, B, D = x.shape
    N = T * B
    x2d = x.reshape(N, D)

    gamma = params["ln_gamma"]   # (L, 1, D)
    beta = params["ln_beta"]     # (L, 1, D)
    w1 = params["w1"]            # (L, D, Bn)   (stored transposed: in x out)
    b1 = params["b1"]            # (L, 1, Bn)
    w2 = params["w2"]            # (L, Bn, D)
    b2 = params["b2"]            # (L, 1, D)
    Bn = w1.shape[-1]

    # --- lane-dense padding of Bn (exact: zero W1 cols / b1 / W2 rows) -------
    Bn_pad = _round_up(Bn, 128)
    if Bn_pad != Bn:
        pb = Bn_pad - Bn
        w1 = jnp.pad(w1, ((0, 0), (0, 0), (0, pb)))
        b1 = jnp.pad(b1, ((0, 0), (0, 0), (0, pb)))
        w2 = jnp.pad(w2, ((0, 0), (0, pb), (0, 0)))

    # --- lane-dense feature dim (exact: zero gamma/beta/b2/W1-rows/W2-cols) --
    D_pad = _round_up(D, 128)
    if D_pad != D:
        # NOTE: this also pads the activation (one extra HBM pass); production
        # shapes should use D % 128 == 0 so this branch is never taken.
        pd = D_pad - D
        gamma = jnp.pad(gamma, ((0, 0), (0, 0), (0, pd)))
        beta = jnp.pad(beta, ((0, 0), (0, 0), (0, pd)))
        b2 = jnp.pad(b2, ((0, 0), (0, 0), (0, pd)))
        w1 = jnp.pad(w1, ((0, 0), (0, pd), (0, 0)))
        w2 = jnp.pad(w2, ((0, 0), (0, 0), (0, pd)))
        x2d = jnp.pad(x2d, ((0, 0), (0, pd)))

    # Pre-cast the big matmul operands once here, not per grid step in-kernel.
    w1 = w1.astype(matmul_dtype)
    w2 = w2.astype(matmul_dtype)

    vmem_limit, tile_budget = _vmem_limits()
    if tile_m is None:
        tile_m = _choose_tile_m(N, D_pad, Bn_pad,
                                np.dtype(matmul_dtype).itemsize, tile_budget)
    tile_m = _round_up(min(int(tile_m), _round_up(N, 8)), 8)

    # No token-axis padding: the partial last block relies on Pallas OOB
    # masking.  LayerNorm/FFN are strictly row-local, so garbage in OOB rows
    # stays in OOB rows and their stores are dropped.
    grid = (pl.cdiv(N, tile_m),)
    lang = jnp.asarray(lang_idx, dtype=jnp.int32).reshape((1,))

    tok_spec = pl.BlockSpec((tile_m, D_pad), lambda i, lang_ref: (i, 0))

    # Per-language parameter blocks: leading axis indexed by the prefetched
    # lang_idx.  Their block index never changes across the grid, so they are
    # single-buffered; the freed VMEM goes to bigger token tiles.
    def p_spec(s):
        return pl.BlockSpec((1,) + s, lambda i, lang_ref: (lang_ref[0], 0, 0),
                            pipeline_mode=pl.Buffered(1))

    extra = {}
    if alias_input:
        # Write the result back into the activation buffer.  Operand indices
        # count the scalar-prefetch arg: lang=0, x2d=1.  Only a net win when
        # x2d is donatable (caller donates x, or x2d is an in-jit temporary
        # such as the D-padded copy above); otherwise XLA inserts a copy.
        extra = dict(input_output_aliases={1: 0})

    out = pl.pallas_call(
        functools.partial(adapter_kernel, inv_d=1.0 / D, matmul_dtype=matmul_dtype),
        out_shape=jax.ShapeDtypeStruct((N, D_pad), x.dtype),
        grid_spec=pltpu.PrefetchScalarGridSpec(
            num_scalar_prefetch=1,
            grid=grid,
            in_specs=[
                tok_spec,                    # x tile
                p_spec((1, D_pad)),          # ln gamma
                p_spec((1, D_pad)),          # ln beta
                p_spec((D_pad, Bn_pad)),     # W1 (D_pad, Bn_pad)
                p_spec((1, Bn_pad)),         # b1
                p_spec((Bn_pad, D_pad)),     # W2 (Bn_pad, D_pad)
                p_spec((1, D_pad)),          # b2
            ],
            out_specs=tok_spec,
        ),
        compiler_params=pltpu.CompilerParams(
            # TODO(synk): on v7x verify the token grid is sharded across both
            # TensorCores; if not, switch to pltpu.CORE_PARALLEL / pl.core_map.
            dimension_semantics=("parallel",),
            vmem_limit_bytes=vmem_limit,
        ),
        **extra,
    )(lang, x2d, gamma, beta, w1, b1, w2, b2)

    if D_pad != D:
        out = out[:, :D]
    return out.reshape(T, B, D)


def init_params(key, num_src_lang, input_dim, bottleneck_dim):
    """Deterministic synthetic parameters (stacked over languages)."""
    ks = jax.random.split(key, 4)
    D, Bn, L = input_dim, bottleneck_dim, num_src_lang
    return {
        "ln_gamma": jnp.ones((L, 1, D), jnp.float32),
        "ln_beta": jnp.zeros((L, 1, D), jnp.float32),
        # Linear weights stored pre-transposed as (in, out) for the kernel.
        "w1": jax.random.normal(ks[0], (L, D, Bn), jnp.float32) * 0.05,
        "b1": jax.random.normal(ks[1], (L, 1, Bn), jnp.float32) * 0.01,
        "w2": jax.random.normal(ks[2], (L, Bn, D), jnp.float32) * 0.05,
        "b2": jax.random.normal(ks[3], (L, 1, D), jnp.float32) * 0.01,
    }


def reference(x, lang_idx, params):
    """Pure-JAX reference of the PyTorch forward (eval mode)."""
    g = params["ln_gamma"][lang_idx, 0]
    b = params["ln_beta"][lang_idx, 0]
    w1 = params["w1"][lang_idx]
    b1 = params["b1"][lang_idx, 0]
    w2 = params["w2"][lang_idx]
    b2 = params["b2"][lang_idx, 0]
    mu = jnp.mean(x, axis=-1, keepdims=True)
    var = jnp.mean((x - mu) ** 2, axis=-1, keepdims=True)
    xn = (x - mu) / jnp.sqrt(var + LN_EPS) * g + b
    h = jnp.maximum(xn @ w1 + b1, 0.0)
    return x + (h @ w2 + b2)


if __name__ == "__main__":
    # Small shapes consistent with the module: seq=8, batch=2, input_dim=32,
    # bottleneck_dim=16, num_src_lang=3.
    T, B, D = 8, 2, 32
    Bn, L = 16, 3

    key = jax.random.PRNGKey(0)
    kx, kp, kx2 = jax.random.split(key, 3)
    x = jax.random.normal(kx, (T, B, D), jnp.float32)
    params = init_params(kp, L, D, Bn)

    # 1) Default f32 path; also exercises input/output aliasing (x2d is an
    #    in-jit temporary here because D=32 gets lane-padded to 128).
    out = jax.block_until_ready(multilingual_adapter(x, 1, params, alias_input=True))
    ref = reference(x, 1, params)
    assert out.shape == (T, B, D)
    assert jnp.allclose(out, ref, atol=1e-4, rtol=1e-4), "mismatch vs reference (f32)"

    # 2) Token count NOT a multiple of the tile -> exercises the partial last
    #    block (Pallas OOB masking) with no wrapper-side token padding.
    T2, B2 = 7, 3
    x2 = jax.random.normal(kx2, (T2, B2, D), jnp.float32)
    out2 = jax.block_until_ready(multilingual_adapter(x2, 2, params, tile_m=16))
    ref2 = reference(x2, 2, params)
    assert out2.shape == (T2, B2, D)
    assert jnp.allclose(out2, ref2, atol=1e-4, rtol=1e-4), "tail-tile mismatch"

    # 3) bf16 matmul path (weights pre-cast in the wrapper) -- looser tolerance.
    out3 = jax.block_until_ready(
        multilingual_adapter(x, 0, params, matmul_dtype=jnp.bfloat16))
    ref3 = reference(x, 0, params)
    assert out3.shape == (T, B, D)
    assert jnp.allclose(out3, ref3, atol=5e-2, rtol=5e-2), "mismatch vs reference (bf16)"

    print("KERNEL_OK")
</pallas_src>

<mosaic_0001>
module attributes {stable_mosaic.version = 11 : i64} {
  func.func @adapter_kernel(%arg0: i32, %arg1: memref<1xi32, #tpu.memory_space<smem>>, %arg2: memref<16x128xf32, #tpu.memory_space<vmem>>, %arg3: memref<1x1x128xf32, #tpu.memory_space<vmem>>, %arg4: memref<1x1x128xf32, #tpu.memory_space<vmem>>, %arg5: memref<1x128x128xf32, #tpu.memory_space<vmem>>, %arg6: memref<1x1x128xf32, #tpu.memory_space<vmem>>, %arg7: memref<1x128x128xf32, #tpu.memory_space<vmem>>, %arg8: memref<1x1x128xf32, #tpu.memory_space<vmem>>, %arg9: memref<16x128xf32, #tpu.memory_space<vmem>>) attributes {dimension_semantics = [#tpu.dimension_semantics<parallel>], iteration_bounds = array<i64: 1>, scalar_prefetch = 1 : i64, scratch_operands = 0 : i64, tpu.core_type = #tpu.core_type<tc>, window_params = [{transform_indices = @transform_0, window_bounds = array<i64: 16, 128>}, {pipeline_mode = #tpu.pipeline_mode<synchronous>, transform_indices = @transform_1, window_bounds = array<i64: 1, 1, 128>}, {pipeline_mode = #tpu.pipeline_mode<synchronous>, transform_indices = @transform_2, window_bounds = array<i64: 1, 1, 128>}, {pipeline_mode = #tpu.pipeline_mode<synchronous>, transform_indices = @transform_3, window_bounds = array<i64: 1, 128, 128>}, {pipeline_mode = #tpu.pipeline_mode<synchronous>, transform_indices = @transform_4, window_bounds = array<i64: 1, 1, 128>}, {pipeline_mode = #tpu.pipeline_mode<synchronous>, transform_indices = @transform_5, window_bounds = array<i64: 1, 128, 128>}, {pipeline_mode = #tpu.pipeline_mode<synchronous>, transform_indices = @transform_6, window_bounds = array<i64: 1, 1, 128>}, {transform_indices = @transform_7, window_bounds = array<i64: 16, 128>}]} {
    %c0 = arith.constant 0 : index
    %c0_0 = arith.constant 0 : index
    %0 = vector.load %arg2[%c0, %c0_0] : memref<16x128xf32, #tpu.memory_space<vmem>>, vector<16x128xf32>
    %cst = arith.constant dense<0.000000e+00> : vector<16xf32>
    %1 = vector.multi_reduction <add>, %0, %cst [1] : vector<16x128xf32> to vector<16xf32>
    %2 = vector.shape_cast %1 : vector<16xf32> to vector<16x1xf32>
    %3 = arith.mulf %0, %0 : vector<16x128xf32>
    %cst_1 = arith.constant dense<0.000000e+00> : vector<16xf32>
    %4 = vector.multi_reduction <add>, %3, %cst_1 [1] : vector<16x128xf32> to vector<16xf32>
    %5 = vector.shape_cast %4 : vector<16xf32> to vector<16x1xf32>
    %cst_2 = arith.constant 3.125000e-02 : f32
    %6 = vector.broadcast %cst_2 : f32 to vector<16x1xf32>
    %7 = arith.mulf %2, %6 : vector<16x1xf32>
    %cst_3 = arith.constant 3.125000e-02 : f32
    %8 = vector.broadcast %cst_3 : f32 to vector<16x1xf32>
    %9 = arith.mulf %5, %8 : vector<16x1xf32>
    %10 = arith.mulf %7, %7 : vector<16x1xf32>
    %11 = arith.subf %9, %10 : vector<16x1xf32>
    %cst_4 = arith.constant 0.000000e+00 : f32
    %12 = vector.broadcast %cst_4 : f32 to vector<16x1xf32>
    %13 = arith.maximumf %11, %12 : vector<16x1xf32>
    %14 = vector.broadcast %7 : vector<16x1xf32> to vector<16x128xf32>
    %15 = arith.subf %0, %14 : vector<16x128xf32>
    %cst_5 = arith.constant 9.99999974E-6 : f32
    %16 = vector.broadcast %cst_5 : f32 to vector<16x1xf32>
    %17 = arith.addf %13, %16 : vector<16x1xf32>
    %18 = math.rsqrt %17 : vector<16x1xf32>
    %19 = vector.broadcast %18 : vector<16x1xf32> to vector<16x128xf32>
    %20 = arith.mulf %15, %19 : vector<16x128xf32>
    %c0_6 = arith.constant 0 : index
    %c0_7 = arith.constant 0 : index
    %c0_8 = arith.constant 0 : index
    %21 = vector.load %arg3[%c0_6, %c0_7, %c0_8] : memref<1x1x128xf32, #tpu.memory_space<vmem>>, vector<1x1x128xf32>
    %22 = vector.shape_cast %21 : vector<1x1x128xf32> to vector<1x128xf32>
    %23 = vector.broadcast %22 : vector<1x128xf32> to vector<16x128xf32>
    %24 = arith.mulf %20, %23 : vector<16x128xf32>
    %c0_9 = arith.constant 0 : index
    %c0_10 = arith.constant 0 : index
    %c0_11 = arith.constant 0 : index
    %25 = vector.load %arg4[%c0_9, %c0_10, %c0_11] : memref<1x1x128xf32, #tpu.memory_space<vmem>>, vector<1x1x128xf32>
    %26 = vector.shape_cast %25 : vector<1x1x128xf32> to vector<1x128xf32>
    %27 = vector.broadcast %26 : vector<1x128xf32> to vector<16x128xf32>
    %28 = arith.addf %24, %27 : vector<16x128xf32>
    %c0_12 = arith.constant 0 : index
    %c0_13 = arith.constant 0 : index
    %c0_14 = arith.constant 0 : index
    %29 = vector.load %arg5[%c0_12, %c0_13, %c0_14] : memref<1x128x128xf32, #tpu.memory_space<vmem>>, vector<1x128x128xf32>
    %30 = vector.shape_cast %29 : vector<1x128x128xf32> to vector<128x128xf32>
    %cst_15 = arith.constant dense<0.000000e+00> : vector<16x128xf32>
    %31 = tpu.matmul %28, %30, %cst_15 {dimension_numbers = #tpu.dot_dimension_numbers<[1], [0], [0], [1], [0, 0, 1, 1], [], []>} : vector<16x128xf32>, vector<128x128xf32>, vector<16x128xf32> -> vector<16x128xf32>
    %c0_16 = arith.constant 0 : index
    %c0_17 = arith.constant 0 : index
    %c0_18 = arith.constant 0 : index
    %32 = vector.load %arg6[%c0_16, %c0_17, %c0_18] : memref<1x1x128xf32, #tpu.memory_space<vmem>>, vector<1x1x128xf32>
    %33 = vector.shape_cast %32 : vector<1x1x128xf32> to vector<1x128xf32>
    %34 = vector.broadcast %33 : vector<1x128xf32> to vector<16x128xf32>
    %35 = arith.addf %31, %34 : vector<16x128xf32>
    %cst_19 = arith.constant 0.000000e+00 : f32
    %36 = vector.broadcast %cst_19 : f32 to vector<16x128xf32>
    %37 = arith.maximumf %35, %36 : vector<16x128xf32>
    %c0_20 = arith.constant 0 : index
    %c0_21 = arith.constant 0 : index
    %c0_22 = arith.constant 0 : index
    %38 = vector.load %arg7[%c0_20, %c0_21, %c0_22] : memref<1x128x128xf32, #tpu.memory_space<vmem>>, vector<1x128x128xf32>
    %39 = vector.shape_cast %38 : vector<1x128x128xf32> to vector<128x128xf32>
    %cst_23 = arith.constant dense<0.000000e+00> : vector<16x128xf32>
    %40 = tpu.matmul %37, %39, %cst_23 {dimension_numbers = #tpu.dot_dimension_numbers<[1], [0], [0], [1], [0, 0, 1, 1], [], []>} : vector<16x128xf32>, vector<128x128xf32>, vector<16x128xf32> -> vector<16x128xf32>
    %c0_24 = arith.constant 0 : index
    %c0_25 = arith.constant 0 : index
    %c0_26 = arith.constant 0 : index
    %41 = vector.load %arg8[%c0_24, %c0_25, %c0_26] : memref<1x1x128xf32, #tpu.memory_space<vmem>>, vector<1x1x128xf32>
    %42 = vector.shape_cast %41 : vector<1x1x128xf32> to vector<1x128xf32>
    %43 = vector.broadcast %42 : vector<1x128xf32> to vector<16x128xf32>
    %44 = arith.addf %40, %43 : vector<16x128xf32>
    %45 = arith.addf %0, %44 : vector<16x128xf32>
    %c0_27 = arith.constant 0 : index
    %c0_28 = arith.constant 0 : index
    %46 = vector.load %arg9[%c0_27, %c0_28] : memref<16x128xf32, #tpu.memory_space<vmem>>, vector<16x128xf32>
    tpu.vector_store %arg9[%c0_27, %c0_28], %45 {strides = array<i32>} : memref<16x128xf32, #tpu.memory_space<vmem>>, vector<16x128xf32>,
    return
  }
  func.func @transform_0(%arg0: i32, %arg1: memref<1xi32, #tpu.memory_space<smem>>) -> (i32, i32) {
    %c0_i32 = arith.constant 0 : i32
    %c0_i32_0 = arith.constant 0 : i32
    return %arg0, %c0_i32 : i32, i32
  }
  func.func @transform_1(%arg0: i32, %arg1: memref<1xi32, #tpu.memory_space<smem>>) -> (i32, i32, i32) {
    %c0 = arith.constant 0 : index
    %0 = memref.load %arg1[%c0] : memref<1xi32, #tpu.memory_space<smem>>
    %c0_i32 = arith.constant 0 : i32
    %c0_i32_0 = arith.constant 0 : i32
    %c0_i32_1 = arith.constant 0 : i32
    return %0, %c0_i32, %c0_i32_0 : i32, i32, i32
  }
  func.func @transform_2(%arg0: i32, %arg1: memref<1xi32, #tpu.memory_space<smem>>) -> (i32, i32, i32) {
    %c0 = arith.constant 0 : index
    %0 = memref.load %arg1[%c0] : memref<1xi32, #tpu.memory_space<smem>>
    %c0_i32 = arith.constant 0 : i32
    %c0_i32_0 = arith.constant 0 : i32
    %c0_i32_1 = arith.constant 0 : i32
    return %0, %c0_i32, %c0_i32_0 : i32, i32, i32
  }
  func.func @transform_3(%arg0: i32, %arg1: memref<1xi32, #tpu.memory_space<smem>>) -> (i32, i32, i32) {
    %c0 = arith.constant 0 : index
    %0 = memref.load %arg1[%c0] : memref<1xi32, #tpu.memory_space<smem>>
    %c0_i32 = arith.constant 0 : i32
    %c0_i32_0 = arith.constant 0 : i32
    %c0_i32_1 = arith.constant 0 : i32
    return %0, %c0_i32, %c0_i32_0 : i32, i32, i32
  }
  func.func @transform_4(%arg0: i32, %arg1: memref<1xi32, #tpu.memory_space<smem>>) -> (i32, i32, i32) {
    %c0 = arith.constant 0 : index
    %0 = memref.load %arg1[%c0] : memref<1xi32, #tpu.memory_space<smem>>
    %c0_i32 = arith.constant 0 : i32
    %c0_i32_0 = arith.constant 0 : i32
    %c0_i32_1 = arith.constant 0 : i32
    return %0, %c0_i32, %c0_i32_0 : i32, i32, i32
  }
  func.func @transform_5(%arg0: i32, %arg1: memref<1xi32, #tpu.memory_space<smem>>) -> (i32, i32, i32) {
    %c0 = arith.constant 0 : index
    %0 = memref.load %arg1[%c0] : memref<1xi32, #tpu.memory_space<smem>>
    %c0_i32 = arith.constant 0 : i32
    %c0_i32_0 = arith.constant 0 : i32
    %c0_i32_1 = arith.constant 0 : i32
    return %0, %c0_i32, %c0_i32_0 : i32, i32, i32
  }
  func.func @transform_6(%arg0: i32, %arg1: memref<1xi32, #tpu.memory_space<smem>>) -> (i32, i32, i32) {
    %c0 = arith.constant 0 : index
    %0 = memref.load %arg1[%c0] : memref<1xi32, #tpu.memory_space<smem>>
    %c0_i32 = arith.constant 0 : i32
    %c0_i32_0 = arith.constant 0 : i32
    %c0_i32_1 = arith.constant 0 : i32
    return %0, %c0_i32, %c0_i32_0 : i32, i32, i32
  }
  func.func @transform_7(%arg0: i32, %arg1: memref<1xi32, #tpu.memory_space<smem>>) -> (i32, i32) {
    %c0_i32 = arith.constant 0 : i32
    %c0_i32_0 = arith.constant 0 : i32
    return %arg0, %c0_i32 : i32, i32
  }
}

</mosaic_0001>

<bundles_post_ra>
// kernel: multilingual_adapter.1
= control target key start
LH: loop header
LB: loop body
LE: loop exit
PB: predicated region body
PF: predicated region fallthrough
CT: control target
= control target key end

     0   :  { %s517_s1 = inlined_call_operand.vmem [shape: f32[16,128], index: 1, kind: input, shape index: {}, may-alias: {1,8}]   ;;  %s518_s0 = inlined_call_operand.<no memory space> [shape: s32[1], index: 0, kind: input, shape index: {}]   ;;  %s519_s2 = inlined_call_operand.vmem [shape: f32[3,1,128], index: 2, kind: input, shape index: {}]   ;;  %s520_s3 = inlined_call_operand.vmem [shape: f32[3,1,128], index: 3, kind: input, shape index: {}]   ;;  %s521_s5 = inlined_call_operand.vmem [shape: f32[3,1,128], index: 5, kind: input, shape index: {}]   ;;  %s522_s4 = inlined_call_operand.vmem [shape: f32[3,128,128], index: 4, kind: input, shape index: {}]   ;;  %s523_s6 = inlined_call_operand.vmem [shape: f32[3,128,128], index: 6, kind: input, shape index: {}]   ;;  %s524_s7 = inlined_call_operand.vmem [shape: f32[3,1,128], index: 7, kind: input, shape index: {}]   ;;  %s525_s8 = inlined_call_operand.vmem [shape: f32[16,128], index: 8, kind: output, shape index: {}, may-alias: {1,8}]  }
   0x1   :  { %v398_v0 = vld [vmem:[%s517_s1 + $0x8] sm:$0xff]  ;;  %v403_v1 = vld [vmem:[%s517_s1] sm:$0xff]  ;;  %p91_p0 = scmp.lt.s32.totalorder %s518_s0, 2 }
   0x2   :  { %128 = vadd.xlane.f32.xlu0 %v398_v0  ;;  %126 = vadd.xlane.f32.xlu1 %v403_v1  ;;  %v131_v2 = vmul.f32 %v398_v0, %v398_v0  ;;  %v130_v3 = vmul.f32 %v403_v1, %v403_v1 }
   0x3   :  { %s527_s0 = smov (!%p91_p0, %s518_s0), 2 }
   0x4   :  { %s93_s14 = scalar_lea.vmem %s519_s2, %s527_s0  ;;  %s98_s17 = scalar_lea.vmem %s520_s3, %s527_s0 }
   0x5   :  { %s110_s20 = scalar_lea.vmem %s521_s5, %s527_s0  ;;  %s308_s21 = sshll.u32 %s527_s0, 7  ;;  %v342_v62 = vld [vmem:[%s93_s14] ss:$0 sm:$0xff] }
   0x6   :  { %s437_s24 = scalar_lea.vmem %s522_s4, %s308_s21  ;;  %s466_s26 = scalar_lea.vmem %s523_s6, %s308_s21 }
   0x7   :  { %v199_v4 = vld [vmem:[%s437_s24 + $0x78] sm:$0xff]  ;;  %v198_v5 = vld [vmem:[%s437_s24 + $0x70] sm:$0xff]  ;;  %v197_v6 = vld [vmem:[%s437_s24 + $0x68] sm:$0xff]  ;;  %s122_s9 = scalar_lea.vmem %s524_s7, %s527_s0 }
   0x8   :  { %204 = vmatpush.msra.mxu0 %v199_v4  ;;  %310 = vmatpush.msra.mxu2 %v199_v4  ;;  %v196_v7 = vld [vmem:[%s437_s24 + $0x60] sm:$0xff]  ;;  %v195_v8 = vld [vmem:[%s437_s24 + $0x58] sm:$0xff]  ;;  %v194_v9 = vld [vmem:[%s437_s24 + $0x50] sm:$0xff] }
   0x9   :  { %v193_v10 = vld [vmem:[%s437_s24 + $0x48] sm:$0xff]  ;;  %v192_v11 = vld [vmem:[%s437_s24 + $0x40] sm:$0xff]  ;;  %v191_v12 = vld [vmem:[%s437_s24 + $0x38] sm:$0xff] }
   0xa   :  { %134 = vadd.xlane.f32.xlu0 %v131_v2  ;;  %132 = vadd.xlane.f32.xlu1 %v130_v3  ;;  %v190_v13 = vld [vmem:[%s437_s24 + $0x30] sm:$0xff]  ;;  %v189_v14 = vld [vmem:[%s437_s24 + $0x28] sm:$0xff]  ;;  %v188_v15 = vld [vmem:[%s437_s24 + $0x20] sm:$0xff] }
   0xb   :  { %205 = vmatpush.msra.mxu0 %v198_v5  ;;  %311 = vmatpush.msra.mxu2 %v198_v5  ;;  %v187_v18 = vld [vmem:[%s437_s24 + $0x18] sm:$0xff]  ;;  %v186_v19 = vld [vmem:[%s437_s24 + $0x10] sm:$0xff]  ;;  %v185_v21 = vld [vmem:[%s437_s24 + $0x8] sm:$0xff] }
   0xc   :  { %v184_v23 = vld [vmem:[%s437_s24] sm:$0xff]  ;;  %v244_v30 = vld [vmem:[%s466_s26 + $0x78] sm:$0xff]  ;;  %v243_v31 = vld [vmem:[%s466_s26 + $0x70] sm:$0xff] }
   0xd   :  { %206 = vmatpush.msra.mxu0 %v197_v6  ;;  %312 = vmatpush.msra.mxu2 %v197_v6  ;;  %v242_v34 = vld [vmem:[%s466_s26 + $0x68] sm:$0xff]  ;;  %v241_v37 = vld [vmem:[%s466_s26 + $0x60] sm:$0xff]  ;;  %v240_v40 = vld [vmem:[%s466_s26 + $0x58] sm:$0xff] }
   0xe   :  { %249 = vmatpush.msra.mxu1 %v244_v30  ;;  %326 = vmatpush.msra.mxu3 %v244_v30  ;;  %v239_v41 = vld [vmem:[%s466_s26 + $0x50] sm:$0xff]  ;;  %v238_v42 = vld [vmem:[%s466_s26 + $0x48] sm:$0xff]  ;;  %v237_v43 = vld [vmem:[%s466_s26 + $0x40] sm:$0xff] }
   0xf   :  { %207 = vmatpush.msra.mxu0 %v196_v7  ;;  %313 = vmatpush.msra.mxu2 %v196_v7  ;;  %v236_v47 = vld [vmem:[%s466_s26 + $0x38] sm:$0xff]  ;;  %v235_v50 = vld [vmem:[%s466_s26 + $0x30] sm:$0xff]  ;;  %v234_v53 = vld [vmem:[%s466_s26 + $0x28] sm:$0xff] }
  0x10   :  { %250 = vmatpush.msra.mxu1 %v243_v31  ;;  %327 = vmatpush.msra.mxu3 %v243_v31  ;;  %v233_v56 = vld [vmem:[%s466_s26 + $0x20] sm:$0xff]  ;;  %v232_v59 = vld [vmem:[%s466_s26 + $0x18] sm:$0xff] }
  0x11   :  { %208 = vmatpush.msra.mxu0 %v195_v8  ;;  %314 = vmatpush.msra.mxu2 %v195_v8  ;;  %v343_v4 = vld [vmem:[%s98_s17] ss:$0 sm:$0xff] }
  0x12   :  { %251 = vmatpush.msra.mxu1 %v242_v34  ;;  %328 = vmatpush.msra.mxu3 %v242_v34 }
  0x13   :  { %209 = vmatpush.msra.mxu0 %v194_v9  ;;  %315 = vmatpush.msra.mxu2 %v194_v9 }
  0x14   :  { %252 = vmatpush.msra.mxu1 %v241_v37  ;;  %329 = vmatpush.msra.mxu3 %v241_v37 }
  0x15   :  { %210 = vmatpush.msra.mxu0 %v193_v10  ;;  %316 = vmatpush.msra.mxu2 %v193_v10 }
  0x16   :  { %253 = vmatpush.msra.mxu1 %v240_v40  ;;  %330 = vmatpush.msra.mxu3 %v240_v40 }
  0x17   :  { %211 = vmatpush.msra.mxu0 %v192_v11  ;;  %317 = vmatpush.msra.mxu2 %v192_v11  ;;  %v231_v11 = vld [vmem:[%s466_s26 + $0x10] sm:$0xff] }
  0x18   :  { %254 = vmatpush.msra.mxu1 %v239_v41  ;;  %331 = vmatpush.msra.mxu3 %v239_v41 }
  0x19   :  { %212 = vmatpush.msra.mxu0 %v191_v12  ;;  %318 = vmatpush.msra.mxu2 %v191_v12  ;;  %v230_v12 = vld [vmem:[%s466_s26 + $0x8] sm:$0xff] }
  0x1a   :  { %255 = vmatpush.msra.mxu1 %v238_v42  ;;  %332 = vmatpush.msra.mxu3 %v238_v42 }
  0x1b   :  { %213 = vmatpush.msra.mxu0 %v190_v13  ;;  %319 = vmatpush.msra.mxu2 %v190_v13  ;;  %v229_v13 = vld [vmem:[%s466_s26] sm:$0xff] }
  0x1c   :  { %256 = vmatpush.msra.mxu1 %v237_v43  ;;  %333 = vmatpush.msra.mxu3 %v237_v43 }
  0x1d   :  { %214 = vmatpush.msra.mxu0 %v189_v14  ;;  %320 = vmatpush.msra.mxu2 %v189_v14  ;;  %v344_v14 = vld [vmem:[%s110_s20] ss:$0 sm:$0xff] }
  0x1e   :  { %257 = vmatpush.msra.mxu1 %v236_v47  ;;  %334 = vmatpush.msra.mxu3 %v236_v47 }
  0x1f   :  { %215 = vmatpush.msra.mxu0 %v188_v15  ;;  %321 = vmatpush.msra.mxu2 %v188_v15 }
  0x20   :  { %258 = vmatpush.msra.mxu1 %v235_v50  ;;  %335 = vmatpush.msra.mxu3 %v235_v50 }
  0x21   :  { %216 = vmatpush.msra.mxu0 %v187_v18  ;;  %322 = vmatpush.msra.mxu2 %v187_v18 }
  0x22   :  { %259 = vmatpush.msra.mxu1 %v234_v53  ;;  %336 = vmatpush.msra.mxu3 %v234_v53 }
  0x23   :  { %217 = vmatpush.msra.mxu0 %v186_v19  ;;  %323 = vmatpush.msra.mxu2 %v186_v19 }
  0x24   :  { %260 = vmatpush.msra.mxu1 %v233_v56  ;;  %337 = vmatpush.msra.mxu3 %v233_v56 }
  0x25   :  { %218 = vmatpush.msra.mxu0 %v185_v21  ;;  %324 = vmatpush.msra.mxu2 %v185_v21  ;;  %v345_v21 = vld [vmem:[%s122_s9] ss:$0 sm:$0xff] }
  0x26   :  { %261 = vmatpush.msra.mxu1 %v232_v59  ;;  %338 = vmatpush.msra.mxu3 %v232_v59 }
  0x27   :  { %219 = vmatpush.msra.mxu0 %v184_v23  ;;  %325 = vmatpush.msra.mxu2 %v184_v23 }
  0x28   :  { %262 = vmatpush.msra.mxu1 %v231_v11  ;;  %339 = vmatpush.msra.mxu3 %v231_v11 }
  0x2a   :  { %263 = vmatpush.msra.mxu1 %v230_v12  ;;  %340 = vmatpush.msra.mxu3 %v230_v12 }
  0x2c   :  { %264 = vmatpush.msra.mxu1 %v229_v13  ;;  %341 = vmatpush.msra.mxu3 %v229_v13 }
  0x75   :  { %v129_v16 = vpop.xlane.xlu0 %128  ;;  %v127_v17 = vpop.xlane.xlu1 %126 }
  0x76   :  { %v453_v20 = vmul.f32 0.03125, %v127_v17  ;;  %v456_v22 = vmul.f32 0.03125, %v129_v16 }
  0x78   :  { %v140_v24 = vmul.f32 %v453_v20, %v453_v20  ;;  %v141_v27 = vmul.f32 %v456_v22, %v456_v22  ;;  %v147_v60 = vsub.f32 %v398_v0, %v456_v22  ;;  %v146_v63 = vsub.f32 %v403_v1, %v453_v20 }
  0x7d   :  { %v135_v25 = vpop.xlane.xlu0 %134  ;;  %v133_v26 = vpop.xlane.xlu1 %132 }
  0x7e   :  { %v139_v28 = vmul.f32 0.03125, %v135_v25  ;;  %v138_v29 = vmul.f32 0.03125, %v133_v26 }
  0x80   :  { %v143_v32 = vsub.f32 %v139_v28, %v141_v27  ;;  %v142_v33 = vsub.f32 %v138_v29, %v140_v24 }
  0x82   :  { %v145_v35 = vmax.f32 %v143_v32, 0.0  ;;  %v144_v36 = vmax.f32 %v142_v33, 0.0 }
  0x84   :  { %v149_v38 = vadd.f32 1e-05, %v145_v35  ;;  %v148_v39 = vadd.f32 1e-05, %v144_v36 }
  0x86   :  { %346 = vrsqrt.f32 %v149_v38  ;;  %vm156_vm1 = vweird.f32 %v148_v39  ;;  %vm166_vm3 = vweird.f32 %v149_v38 }
  0x87   :  { %348 = vrsqrt.f32 %v148_v39 }
  0x8c   :  { %v347_v44 = vpop.eup %346 }
  0x8d   :  { %v349_v45 = vpop.eup %348  ;;  %v161_v46 = vmul.f32 %v347_v44, %v149_v38  ;;  %vm167_vm0 = vweird.f32 %v347_v44 }
  0x8e   :  { %v151_v48 = vmul.f32 %v349_v45, %v148_v39  ;;  %vm157_vm2 = vweird.f32 %v349_v45  ;;  %vm168_vm4 = vmor %vm166_vm3, %vm167_vm0 }
  0x8f   :  { %v162_v49 = vmul.f32 %v347_v44, %v161_v46  ;;  %vm158_vm5 = vmor %vm156_vm1, %vm157_vm2 }
  0x90   :  { %v152_v51 = vmul.f32 %v349_v45, %v151_v48 }
  0x91   :  { %v163_v52 = vmul.f32 0.5, %v162_v49 }
  0x92   :  { %v153_v54 = vmul.f32 0.5, %v152_v51 }
  0x93   :  { %v164_v55 = vsub.f32 1.5, %v163_v52 }
  0x94   :  { %v154_v57 = vsub.f32 1.5, %v153_v54 }
  0x95   :  { %v165_v58 = vmul.f32 %v347_v44, %v164_v55 }
  0x96   :  { %v155_v61 = vmul.f32 %v349_v45, %v154_v57 }
  0x97   :  { %v169_v2 = vsel %vm168_vm4, %v347_v44, %v165_v58 }
  0x98   :  { %v159_v3 = vsel %vm158_vm5, %v349_v45, %v155_v61  ;;  %v171_v5 = vmul.f32 %v169_v2, %v147_v60 }
  0x99   :  { %v170_v6 = vmul.f32 %v159_v3, %v146_v63 }
  0x9a   :  { %v177_v7 = vmul.f32 %v342_v62, %v171_v5 }
  0x9b   :  { %v176_v8 = vmul.f32 %v342_v62, %v170_v6 }
  0x9c   :  { %v183_v9 = vadd.f32 %v343_v4, %v177_v7 }
  0x9d   :  { %v182_v10 = vadd.f32 %v343_v4, %v176_v8 }
  0x9e   :  { %223 = vmatmul.f32.vlgmr.msra.gmra.mxu2 %v183_v9 }
  0x9f   :  { %220 = vmatmul.f32.vlgmr.msra.gmra.mxu0 %v182_v10 }
 0x11c   :  { %v221_v15 = vpop.f32.mrf.mxu0 }
 0x11d   :  { %v222_v16 = vadd.f32 %v344_v14, %v221_v15 }
 0x11f   :  { %v227_v17 = vmax.f32 %v222_v16, 0.0 }
 0x121   :  { %265 = vmatmul.f32.vlgmr.msra.gmra.mxu1 %v227_v17  ;;  %v224_v18 = vpop.f32.mrf.mxu2 }
 0x122   :  { %v225_v19 = vadd.f32 %v344_v14, %v224_v18 }
 0x124   :  { %v228_v20 = vmax.f32 %v225_v19, 0.0 }
 0x126   :  { %268 = vmatmul.f32.vlgmr.msra.gmra.mxu3 %v228_v20 }
 0x19e   :  { %v266_v22 = vpop.f32.mrf.mxu1 }
 0x19f   :  { %v267_v23 = vadd.f32 %v345_v21, %v266_v22 }
 0x1a1   :  { %v272_v24 = vadd.f32 %v267_v23, %v403_v1 }
 0x1a3   :  { %274 = vst [vmem:[%s525_s8] sm:$0xff] %v272_v24 }
 0x1a9   :  { %v269_v25 = vpop.f32.mrf.mxu3 }
 0x1aa   :  { %v270_v26 = vadd.f32 %v345_v21, %v269_v25 }
 0x1ac   :  { %v273_v27 = vadd.f32 %v270_v26, %v398_v0 }
 0x1ae   :  { %275 = vst [vmem:[%s525_s8 + $0x8] sm:$0xff] %v273_v27 }

</bundles_post_ra>
